<compile_context>
chip_gen: v7x
topology: tpu7x:2x2x1
jax: 0.10.0
libtpu: 0.0.40
codegen_flags: <defaults>
</compile_context>

<pallas_src>
import functools

import jax
import jax.numpy as jnp
from jax import lax
from jax.experimental import pallas as pl
from jax.experimental.pallas import tpu as pltpu

EPS = 1e-5
LANE = 128


def _round_up(x, m):
    return (x + m - 1) // m * m


@functools.lru_cache(maxsize=1)
def _vmem_params():
    """(vmem_limit_bytes, row_tile_budget_bytes) derived from chip capacity."""
    try:
        cap = int(pltpu.get_tpu_info().vmem_capacity_bytes)
    except Exception:
        cap = 64 * 1024 * 1024          # conservative fallback (v7x-sized)
    limit = max(48 * 1024 * 1024, min((cap * 3) // 4, 96 * 1024 * 1024))
    return limit, limit // 2


def _pick_tile_m(m, row_bytes, fixed_bytes, budget):
    """Largest multiple-of-16 row tile (<=2048) whose double-buffered,
    grid-varying working set plus fixed operands stays inside the budget,
    capped so the 1-D grid has >= 2 steps (megacore on v7x)."""
    avail = max(budget - fixed_bytes, 4 * 1024 * 1024)
    tm = 2048
    while tm > 16 and 2 * tm * row_bytes > avail:
        tm //= 2
    tm = min(tm, _round_up(m, 16))
    if m >= 32:                          # >= 2 grid steps -> both TCs busy
        tm = min(tm, _round_up((m + 1) // 2, 16))
    return max(16, tm)


def _compiler_params(vmem_limit):
    return pltpu.CompilerParams(dimension_semantics=("parallel",),
                                vmem_limit_bytes=vmem_limit)


# ------------------------------ Pallas kernels ------------------------------

def _matmul_stats_kernel(p_ref, w_ref, y_ref, s0_ref, s1_ref):
    """One M-tile of conv-as-matmul. Emits the raw conv output tile plus the
    tile's per-column sum and sum-of-squares (single pass, f32) so the
    BatchNorm batch statistics can be reduced across tiles outside the grid."""
    y = jnp.dot(p_ref[...], w_ref[...], preferred_element_type=jnp.float32)
    y_ref[...] = y.astype(y_ref.dtype)
    s0_ref[...] = jnp.sum(y, axis=0, keepdims=True)[None]
    s1_ref[...] = jnp.sum(y * y, axis=0, keepdims=True)[None]


def _bn_add_relu_kernel(y_ref, scale_ref, shift_ref, s_ref, o_ref):
    """BN affine (precomputed scale/shift) + identity/maxpool shortcut + ReLU."""
    y = y_ref[...].astype(jnp.float32)
    s = s_ref[...].astype(jnp.float32)
    o = y * scale_ref[...] + shift_ref[...] + s
    o_ref[...] = jnp.maximum(o, 0.0).astype(o_ref.dtype)


def _bn_conv_shortcut_relu_kernel(y_ref, scale_ref, shift_ref,
                                  s_ref, ws_ref, bs_ref, o_ref):
    """BN affine + fused 1x1-conv shortcut (MXU matmul) + ReLU."""
    y = y_ref[...].astype(jnp.float32)
    sc = jnp.dot(s_ref[...], ws_ref[...], preferred_element_type=jnp.float32)
    o = y * scale_ref[...] + shift_ref[...] + sc + bs_ref[...]
    o_ref[...] = jnp.maximum(o, 0.0).astype(o_ref.dtype)


# ----------------------------------- glue -----------------------------------

def _im2col(x_nhwc, k, stride, pad):
    """Extract k x k patches -> (N*Ho*Wo, k*k*C); row order matches conv taps.
    Dtype is preserved, so feeding compute_dtype activations keeps the
    materialized patch matrix at half width for bf16."""
    N, H, W, C = x_nhwc.shape
    xp = jnp.pad(x_nhwc, ((0, 0), (pad, pad), (pad, pad), (0, 0)))
    Ho = (H + 2 * pad - k) // stride + 1
    Wo = (W + 2 * pad - k) // stride + 1
    cols = []
    for dy in range(k):
        for dx in range(k):
            cols.append(xp[:, dy:dy + Ho * stride:stride,
                           dx:dx + Wo * stride:stride, :])
    patches = jnp.stack(cols, axis=3)                    # (N, Ho, Wo, k*k, C)
    return patches.reshape(N * Ho * Wo, k * k * C), Ho, Wo


def _conv_w_to_mat(w, cp):
    """OIHW conv weight -> (kh*kw*Cin, Cp) matching _im2col tap order; output
    dim zero-padded to cp. The contraction dim stays unpadded (full-extent
    block is legal and the patch operand dominates HBM bytes)."""
    cout, cin, kh, kw = w.shape
    m = jnp.transpose(w, (2, 3, 1, 0)).reshape(kh * kw * cin, cout)
    return jnp.pad(m.astype(jnp.float32), ((0, 0), (0, cp - cout)))


def _bn_scale_shift(s0, s1, gamma, beta, m_real):
    """Finish the cross-tile BN reduction: batch mean / biased var -> affine.
    One-pass E[x^2]-E[x]^2 in f32, clamped at 0 (see review notes)."""
    mean = s0 / m_real
    var = jnp.maximum(s1 / m_real - mean * mean, 0.0)
    scale = gamma * lax.rsqrt(var + EPS)
    shift = beta - mean * scale
    return scale, shift                                   # (cp,), (cp,)


def _conv_stats(p, w_mat, *, compute_dtype, limit, budget):
    """Pass 1: (patches @ w) on the MXU + per-tile column sum / sum-of-squares.
    Returns (y [mp, cp] in compute_dtype, col_sum, col_sumsq, tm)."""
    m, k = p.shape
    cp = w_mat.shape[1]
    csize = jnp.dtype(compute_dtype).itemsize

    row_bytes = (k + cp) * csize                       # patch row + y row
    fixed = 2 * k * cp * csize + 8 * cp * 4            # weights + stats blocks
    tm = _pick_tile_m(m, row_bytes, fixed, budget)
    mp = _round_up(m, tm)
    grid = (mp // tm,)

    p = p.astype(compute_dtype)
    if mp != m:                        # zero rows contribute 0 to sum / sumsq
        p = jnp.pad(p, ((0, mp - m), (0, 0)))
    w_mat = w_mat.astype(compute_dtype)

    y, s0, s1 = pl.pallas_call(
        _matmul_stats_kernel,
        out_shape=(jax.ShapeDtypeStruct((mp, cp), compute_dtype),
                   jax.ShapeDtypeStruct((grid[0], 1, cp), jnp.float32),
                   jax.ShapeDtypeStruct((grid[0], 1, cp), jnp.float32)),
        grid=grid,
        in_specs=[pl.BlockSpec((tm, k), lambda i: (i, 0)),
                  pl.BlockSpec((k, cp), lambda i: (0, 0))],
        out_specs=(pl.BlockSpec((tm, cp), lambda i: (i, 0)),
                   pl.BlockSpec((1, 1, cp), lambda i: (i, 0, 0)),
                   pl.BlockSpec((1, 1, cp), lambda i: (i, 0, 0))),
        compiler_params=_compiler_params(limit),
    )(p, w_mat)
    return y, jnp.sum(s0, axis=(0, 1)), jnp.sum(s1, axis=(0, 1)), tm


def _bn_epilogue(y, scale, shift, sc, ws, bs, *, m, tm, compute_dtype,
                 out_dtype, limit):
    """Pass 2 (conv2 only): BN affine + fused shortcut + ReLU, tiled with the
    same tm as pass 1. Output is aliased onto y's buffer when dtypes match."""
    mp, cp = y.shape
    grid = (mp // tm,)

    sc = sc.astype(compute_dtype)                       # halve shortcut bytes
    if mp != m:
        sc = jnp.pad(sc, ((0, mp - m), (0, 0)))
    scale = scale.reshape(1, cp).astype(jnp.float32)
    shift = shift.reshape(1, cp).astype(jnp.float32)

    row_spec = lambda c: pl.BlockSpec((tm, c), lambda i: (i, 0))
    vec_spec = pl.BlockSpec((1, cp), lambda i: (0, 0))
    out_shape = jax.ShapeDtypeStruct((mp, cp), out_dtype)
    aliases = {0: 0} if y.dtype == jnp.dtype(out_dtype) else {}
    cparams = _compiler_params(limit)

    if ws is None:                     # identity / maxpool shortcut: plain add
        out = pl.pallas_call(
            _bn_add_relu_kernel, out_shape=out_shape, grid=grid,
            in_specs=[row_spec(cp), vec_spec, vec_spec, row_spec(cp)],
            out_specs=row_spec(cp),
            input_output_aliases=aliases,
            compiler_params=cparams,
        )(y, scale, shift, sc)
    else:                              # 1x1-conv shortcut fused as a matmul
        cs = sc.shape[1]
        out = pl.pallas_call(
            _bn_conv_shortcut_relu_kernel, out_shape=out_shape, grid=grid,
            in_specs=[row_spec(cp), vec_spec, vec_spec, row_spec(cs),
                      pl.BlockSpec((cs, cp), lambda i: (0, 0)), vec_spec],
            out_specs=row_spec(cp),
            input_output_aliases=aliases,
            compiler_params=cparams,
        )(y, scale, shift, sc, ws.astype(compute_dtype),
          bs.astype(jnp.float32).reshape(1, cp))
    return out


def residual_block_B_forward(x_nchw, params, *, input_channel, output_channel,
                             stride, compute_dtype=jnp.bfloat16):
    assert x_nchw.shape[1] == input_channel
    x = jnp.transpose(x_nchw, (0, 2, 3, 1)).astype(jnp.float32)  # NCHW -> NHWC
    N, H, W, Cin = x.shape
    Cout = output_channel
    # Lane-pad the channel dim only when it is already >= 128 lanes wide; for
    # small Cout the true width avoids 16x inflated HBM traffic.
    Cp = Cout if Cout < LANE else _round_up(Cout, LANE)
    limit, budget = _vmem_params()
    pad_c = lambda v: jnp.pad(v.astype(jnp.float32), (0, Cp - Cout))

    # ---- conv1 (3x3 / stride, pad 1): matmul + stats only ----
    # (conv biases b1/b2 are dropped: exactly cancelled by BN mean subtraction)
    p1, H1, W1 = _im2col(x.astype(compute_dtype), 3, stride, 1)
    M1 = N * H1 * W1
    y1, s0, s1, _ = _conv_stats(p1, _conv_w_to_mat(params['w1'], Cp),
                                compute_dtype=compute_dtype,
                                limit=limit, budget=budget)
    scale1, shift1 = _bn_scale_shift(s0, s1, pad_c(params['g1']),
                                     pad_c(params['be1']), M1)
    # conv1's BN + ReLU is folded into the producer of conv2's patches (XLA
    # fuses it with the pad/stack), killing the y1 write + read and a pass.
    y1_act = jnp.maximum(
        y1[:M1].astype(jnp.float32) * scale1[None, :] + shift1[None, :], 0.0)
    y1_act = y1_act[:, :Cout].reshape(N, H1, W1, Cout).astype(compute_dtype)

    # ---- conv2 (3x3 / 1, pad 1): matmul + stats ----
    p2, H2, W2 = _im2col(y1_act, 3, 1, 1)
    M2 = N * H2 * W2
    y2, t0, t1, tm2 = _conv_stats(p2, _conv_w_to_mat(params['w2'], Cp),
                                  compute_dtype=compute_dtype,
                                  limit=limit, budget=budget)
    scale2, shift2 = _bn_scale_shift(t0, t1, pad_c(params['g2']),
                                     pad_c(params['be2']), M2)

    # ---- shortcut operand (fused into conv2's epilogue kernel) ----
    if input_channel == output_channel:
        if stride == 1:
            sc = x.reshape(N * H * W, Cin)
        else:
            # TODO(synk): the tiny maxpool window-max stays in XLA glue.
            Hp, Wp = H // stride, W // stride            # MaxPool2d, floor mode
            xm = x[:, :Hp * stride, :Wp * stride, :].reshape(
                N, Hp, stride, Wp, stride, Cin)
            sc = jnp.max(xm, axis=(2, 4)).reshape(N * Hp * Wp, Cin)
        if Cp != Cout:
            sc = jnp.pad(sc, ((0, 0), (0, Cp - Cout)))
        ws = bs = None
    else:
        sc = x[:, ::stride, ::stride, :].reshape(-1, Cin)       # 1x1-conv input
        ws = jnp.pad(jnp.transpose(params['w3'][:, :, 0, 0],
                                   (1, 0)).astype(jnp.float32),
                     ((0, 0), (0, Cp - Cout)))                  # (Cin, Cp)
        bs = pad_c(params['b3'])                 # conv3 bias (no BN -> kept)
    assert sc.shape[0] == M2, (sc.shape, M2)

    # ---- conv2 epilogue: BN affine + shortcut + ReLU ----
    out = _bn_epilogue(y2, scale2, shift2, sc, ws, bs, m=M2, tm=tm2,
                       compute_dtype=compute_dtype, out_dtype=jnp.float32,
                       limit=limit)
    out = out[:M2].reshape(N, H2, W2, Cp)[..., :Cout]
    return jnp.transpose(out, (0, 3, 1, 2))                     # back to NCHW


# ----------------------------- pure-JAX reference ---------------------------

def _ref_forward(x, params, *, input_channel, output_channel, stride):
    def conv(x, w, b, s, p):
        y = lax.conv_general_dilated(x, w, (s, s), [(p, p), (p, p)],
                                     dimension_numbers=('NCHW', 'OIHW', 'NCHW'))
        return y + b[None, :, None, None]

    def bn(y, g, be):
        mean = jnp.mean(y, axis=(0, 2, 3), keepdims=True)
        var = jnp.mean((y - mean) ** 2, axis=(0, 2, 3), keepdims=True)
        return ((y - mean) * lax.rsqrt(var + EPS)
                * g[None, :, None, None] + be[None, :, None, None])

    y1 = jnp.maximum(bn(conv(x, params['w1'], params['b1'], stride, 1),
                        params['g1'], params['be1']), 0.0)
    y2 = bn(conv(y1, params['w2'], params['b2'], 1, 1),
            params['g2'], params['be2'])
    if input_channel == output_channel:
        if stride == 1:
            sc = x
        else:
            sc = lax.reduce_window(x, -jnp.inf, lax.max,
                                   (1, 1, stride, stride),
                                   (1, 1, stride, stride), 'VALID')
    else:
        sc = conv(x, params['w3'], params['b3'], stride, 0)
    return jnp.maximum(y2 + sc, 0.0)


# ----------------------------------- main -----------------------------------

if __name__ == "__main__":
    key = jax.random.PRNGKey(0)

    def make_params(cin, cout, k):
        ks = jax.random.split(k, 10)
        return {
            'w1': 0.1 * jax.random.normal(ks[0], (cout, cin, 3, 3), jnp.float32),
            'b1': 0.1 * jax.random.normal(ks[1], (cout,), jnp.float32),
            'g1': 1.0 + 0.1 * jax.random.normal(ks[2], (cout,), jnp.float32),
            'be1': 0.1 * jax.random.normal(ks[3], (cout,), jnp.float32),
            'w2': 0.1 * jax.random.normal(ks[4], (cout, cout, 3, 3), jnp.float32),
            'b2': 0.1 * jax.random.normal(ks[5], (cout,), jnp.float32),
            'g2': 1.0 + 0.1 * jax.random.normal(ks[6], (cout,), jnp.float32),
            'be2': 0.1 * jax.random.normal(ks[7], (cout,), jnp.float32),
            'w3': 0.1 * jax.random.normal(ks[8], (cout, cin, 1, 1), jnp.float32),
            'b3': 0.1 * jax.random.normal(ks[9], (cout,), jnp.float32),
        }

    N, H, W = 2, 16, 16
    configs = [
        # (Cin, Cout, stride, compute_dtype, tol) -> covers all kernel variants
        (4, 8, 2, jnp.float32, 1e-4),     # 1x1-conv shortcut, narrow Cout, f32
        (8, 8, 1, jnp.float32, 1e-4),     # identity shortcut (plain add), f32
        (8, 8, 2, jnp.bfloat16, 1e-1),    # maxpool shortcut, bf16 MXU operands
        (16, 128, 2, jnp.float32, 1e-3),  # lane-dense Cp=128 path, conv shortcut
    ]
    for cin, cout, stride, cdt, tol in configs:
        kp, kx, key = jax.random.split(key, 3)
        params = make_params(cin, cout, kp)
        x = jax.random.normal(kx, (N, cin, H, W), jnp.float32)

        fwd = jax.jit(functools.partial(
            residual_block_B_forward, input_channel=cin, output_channel=cout,
            stride=stride, compute_dtype=cdt))
        out = jax.block_until_ready(fwd(x, params))

        ref = _ref_forward(x, params, input_channel=cin,
                           output_channel=cout, stride=stride)
        assert out.shape == ref.shape, (out.shape, ref.shape)
        max_err = float(jnp.max(jnp.abs(out - ref)))
        assert jnp.allclose(out, ref, atol=tol, rtol=tol), \
            (cin, cout, stride, str(cdt), max_err)

    print("KERNEL_OK")
</pallas_src>

<mosaic_0001>
module attributes {stable_mosaic.version = 11 : i64} {
  func.func @_matmul_stats_kernel(%arg0: i32, %arg1: memref<64x36xf32, #tpu.memory_space<vmem>>, %arg2: memref<36x8xf32, #tpu.memory_space<vmem>>, %arg3: memref<64x8xf32, #tpu.memory_space<vmem>>, %arg4: memref<1x1x8xf32, #tpu.memory_space<vmem>>, %arg5: memref<1x1x8xf32, #tpu.memory_space<vmem>>) attributes {dimension_semantics = [#tpu.dimension_semantics<parallel>], iteration_bounds = array<i64: 2>, scalar_prefetch = 0 : i64, scratch_operands = 0 : i64, tpu.core_type = #tpu.core_type<tc>, window_params = [{transform_indices = @transform_0, window_bounds = array<i64: 64, 36>}, {pipeline_mode = #tpu.pipeline_mode<synchronous>, transform_indices = @transform_1, window_bounds = array<i64: 36, 8>}, {transform_indices = @transform_2, window_bounds = array<i64: 64, 8>}, {transform_indices = @transform_3, window_bounds = array<i64: 1, 1, 8>}, {transform_indices = @transform_4, window_bounds = array<i64: 1, 1, 8>}]} {
    %c0 = arith.constant 0 : index
    %c0_0 = arith.constant 0 : index
    %0 = vector.load %arg1[%c0, %c0_0] : memref<64x36xf32, #tpu.memory_space<vmem>>, vector<64x36xf32>
    %c0_1 = arith.constant 0 : index
    %c0_2 = arith.constant 0 : index
    %1 = vector.load %arg2[%c0_1, %c0_2] : memref<36x8xf32, #tpu.memory_space<vmem>>, vector<36x8xf32>
    %cst = arith.constant dense<0.000000e+00> : vector<64x8xf32>
    %2 = tpu.matmul %0, %1, %cst {dimension_numbers = #tpu.dot_dimension_numbers<[1], [0], [0], [1], [0, 0, 1, 1], [], []>} : vector<64x36xf32>, vector<36x8xf32>, vector<64x8xf32> -> vector<64x8xf32>
    %c0_3 = arith.constant 0 : index
    %c0_4 = arith.constant 0 : index
    %3 = vector.load %arg3[%c0_3, %c0_4] : memref<64x8xf32, #tpu.memory_space<vmem>>, vector<64x8xf32>
    tpu.vector_store %arg3[%c0_3, %c0_4], %2 {strides = array<i32>} : memref<64x8xf32, #tpu.memory_space<vmem>>, vector<64x8xf32>,
    %cst_5 = arith.constant dense<0.000000e+00> : vector<8xf32>
    %4 = vector.multi_reduction <add>, %2, %cst_5 [0] : vector<64x8xf32> to vector<8xf32>
    %5 = vector.shape_cast %4 : vector<8xf32> to vector<1x8xf32>
    %6 = vector.shape_cast %5 : vector<1x8xf32> to vector<1x1x8xf32>
    %c0_6 = arith.constant 0 : index
    %c0_7 = arith.constant 0 : index
    %c0_8 = arith.constant 0 : index
    %7 = vector.load %arg4[%c0_6, %c0_7, %c0_8] : memref<1x1x8xf32, #tpu.memory_space<vmem>>, vector<1x1x8xf32>
    tpu.vector_store %arg4[%c0_6, %c0_7, %c0_8], %6 {strides = array<i32>} : memref<1x1x8xf32, #tpu.memory_space<vmem>>, vector<1x1x8xf32>,
    %8 = arith.mulf %2, %2 : vector<64x8xf32>
    %cst_9 = arith.constant dense<0.000000e+00> : vector<8xf32>
    %9 = vector.multi_reduction <add>, %8, %cst_9 [0] : vector<64x8xf32> to vector<8xf32>
    %10 = vector.shape_cast %9 : vector<8xf32> to vector<1x8xf32>
    %11 = vector.shape_cast %10 : vector<1x8xf32> to vector<1x1x8xf32>
    %c0_10 = arith.constant 0 : index
    %c0_11 = arith.constant 0 : index
    %c0_12 = arith.constant 0 : index
    %12 = vector.load %arg5[%c0_10, %c0_11, %c0_12] : memref<1x1x8xf32, #tpu.memory_space<vmem>>, vector<1x1x8xf32>
    tpu.vector_store %arg5[%c0_10, %c0_11, %c0_12], %11 {strides = array<i32>} : memref<1x1x8xf32, #tpu.memory_space<vmem>>, vector<1x1x8xf32>,
    return
  }
  func.func @transform_0(%arg0: i32) -> (i32, i32) {
    %c0_i32 = arith.constant 0 : i32
    %c0_i32_0 = arith.constant 0 : i32
    return %arg0, %c0_i32 : i32, i32
  }
  func.func @transform_1(%arg0: i32) -> (i32, i32) {
    %c0_i32 = arith.constant 0 : i32
    %c0_i32_0 = arith.constant 0 : i32
    %c0_i32_1 = arith.constant 0 : i32
    return %c0_i32, %c0_i32_0 : i32, i32
  }
  func.func @transform_2(%arg0: i32) -> (i32, i32) {
    %c0_i32 = arith.constant 0 : i32
    %c0_i32_0 = arith.constant 0 : i32
    return %arg0, %c0_i32 : i32, i32
  }
  func.func @transform_3(%arg0: i32) -> (i32, i32, i32) {
    %c0_i32 = arith.constant 0 : i32
    %c0_i32_0 = arith.constant 0 : i32
    %c0_i32_1 = arith.constant 0 : i32
    return %arg0, %c0_i32, %c0_i32_0 : i32, i32, i32
  }
  func.func @transform_4(%arg0: i32) -> (i32, i32, i32) {
    %c0_i32 = arith.constant 0 : i32
    %c0_i32_0 = arith.constant 0 : i32
    %c0_i32_1 = arith.constant 0 : i32
    return %arg0, %c0_i32, %c0_i32_0 : i32, i32, i32
  }
}

module attributes {stable_mosaic.version = 11 : i64} {
  func.func @_matmul_stats_kernel(%arg0: i32, %arg1: memref<64x72xf32, #tpu.memory_space<vmem>>, %arg2: memref<72x8xf32, #tpu.memory_space<vmem>>, %arg3: memref<64x8xf32, #tpu.memory_space<vmem>>, %arg4: memref<1x1x8xf32, #tpu.memory_space<vmem>>, %arg5: memref<1x1x8xf32, #tpu.memory_space<vmem>>) attributes {dimension_semantics = [#tpu.dimension_semantics<parallel>], iteration_bounds = array<i64: 2>, scalar_prefetch = 0 : i64, scratch_operands = 0 : i64, tpu.core_type = #tpu.core_type<tc>, window_params = [{transform_indices = @transform_0, window_bounds = array<i64: 64, 72>}, {pipeline_mode = #tpu.pipeline_mode<synchronous>, transform_indices = @transform_1, window_bounds = array<i64: 72, 8>}, {transform_indices = @transform_2, window_bounds = array<i64: 64, 8>}, {transform_indices = @transform_3, window_bounds = array<i64: 1, 1, 8>}, {transform_indices = @transform_4, window_bounds = array<i64: 1, 1, 8>}]} {
    %c0 = arith.constant 0 : index
    %c0_0 = arith.constant 0 : index
    %0 = vector.load %arg1[%c0, %c0_0] : memref<64x72xf32, #tpu.memory_space<vmem>>, vector<64x72xf32>
    %c0_1 = arith.constant 0 : index
    %c0_2 = arith.constant 0 : index
    %1 = vector.load %arg2[%c0_1, %c0_2] : memref<72x8xf32, #tpu.memory_space<vmem>>, vector<72x8xf32>
    %cst = arith.constant dense<0.000000e+00> : vector<64x8xf32>
    %2 = tpu.matmul %0, %1, %cst {dimension_numbers = #tpu.dot_dimension_numbers<[1], [0], [0], [1], [0, 0, 1, 1], [], []>} : vector<64x72xf32>, vector<72x8xf32>, vector<64x8xf32> -> vector<64x8xf32>
    %c0_3 = arith.constant 0 : index
    %c0_4 = arith.constant 0 : index
    %3 = vector.load %arg3[%c0_3, %c0_4] : memref<64x8xf32, #tpu.memory_space<vmem>>, vector<64x8xf32>
    tpu.vector_store %arg3[%c0_3, %c0_4], %2 {strides = array<i32>} : memref<64x8xf32, #tpu.memory_space<vmem>>, vector<64x8xf32>,
    %cst_5 = arith.constant dense<0.000000e+00> : vector<8xf32>
    %4 = vector.multi_reduction <add>, %2, %cst_5 [0] : vector<64x8xf32> to vector<8xf32>
    %5 = vector.shape_cast %4 : vector<8xf32> to vector<1x8xf32>
    %6 = vector.shape_cast %5 : vector<1x8xf32> to vector<1x1x8xf32>
    %c0_6 = arith.constant 0 : index
    %c0_7 = arith.constant 0 : index
    %c0_8 = arith.constant 0 : index
    %7 = vector.load %arg4[%c0_6, %c0_7, %c0_8] : memref<1x1x8xf32, #tpu.memory_space<vmem>>, vector<1x1x8xf32>
    tpu.vector_store %arg4[%c0_6, %c0_7, %c0_8], %6 {strides = array<i32>} : memref<1x1x8xf32, #tpu.memory_space<vmem>>, vector<1x1x8xf32>,
    %8 = arith.mulf %2, %2 : vector<64x8xf32>
    %cst_9 = arith.constant dense<0.000000e+00> : vector<8xf32>
    %9 = vector.multi_reduction <add>, %8, %cst_9 [0] : vector<64x8xf32> to vector<8xf32>
    %10 = vector.shape_cast %9 : vector<8xf32> to vector<1x8xf32>
    %11 = vector.shape_cast %10 : vector<1x8xf32> to vector<1x1x8xf32>
    %c0_10 = arith.constant 0 : index
    %c0_11 = arith.constant 0 : index
    %c0_12 = arith.constant 0 : index
    %12 = vector.load %arg5[%c0_10, %c0_11, %c0_12] : memref<1x1x8xf32, #tpu.memory_space<vmem>>, vector<1x1x8xf32>
    tpu.vector_store %arg5[%c0_10, %c0_11, %c0_12], %11 {strides = array<i32>} : memref<1x1x8xf32, #tpu.memory_space<vmem>>, vector<1x1x8xf32>,
    return
  }
  func.func @transform_0(%arg0: i32) -> (i32, i32) {
    %c0_i32 = arith.constant 0 : i32
    %c0_i32_0 = arith.constant 0 : i32
    return %arg0, %c0_i32 : i32, i32
  }
  func.func @transform_1(%arg0: i32) -> (i32, i32) {
    %c0_i32 = arith.constant 0 : i32
    %c0_i32_0 = arith.constant 0 : i32
    %c0_i32_1 = arith.constant 0 : i32
    return %c0_i32, %c0_i32_0 : i32, i32
  }
  func.func @transform_2(%arg0: i32) -> (i32, i32) {
    %c0_i32 = arith.constant 0 : i32
    %c0_i32_0 = arith.constant 0 : i32
    return %arg0, %c0_i32 : i32, i32
  }
  func.func @transform_3(%arg0: i32) -> (i32, i32, i32) {
    %c0_i32 = arith.constant 0 : i32
    %c0_i32_0 = arith.constant 0 : i32
    %c0_i32_1 = arith.constant 0 : i32
    return %arg0, %c0_i32, %c0_i32_0 : i32, i32, i32
  }
  func.func @transform_4(%arg0: i32) -> (i32, i32, i32) {
    %c0_i32 = arith.constant 0 : i32
    %c0_i32_0 = arith.constant 0 : i32
    %c0_i32_1 = arith.constant 0 : i32
    return %arg0, %c0_i32, %c0_i32_0 : i32, i32, i32
  }
}

module attributes {stable_mosaic.version = 11 : i64} {
  func.func @_bn_conv_shortcut_relu_kernel(%arg0: i32, %arg1: memref<64x8xf32, #tpu.memory_space<vmem>>, %arg2: memref<1x8xf32, #tpu.memory_space<vmem>>, %arg3: memref<1x8xf32, #tpu.memory_space<vmem>>, %arg4: memref<64x4xf32, #tpu.memory_space<vmem>>, %arg5: memref<4x8xf32, #tpu.memory_space<vmem>>, %arg6: memref<1x8xf32, #tpu.memory_space<vmem>>, %arg7: memref<64x8xf32, #tpu.memory_space<vmem>>) attributes {dimension_semantics = [#tpu.dimension_semantics<parallel>], iteration_bounds = array<i64: 2>, scalar_prefetch = 0 : i64, scratch_operands = 0 : i64, tpu.core_type = #tpu.core_type<tc>, window_params = [{transform_indices = @transform_0, window_bounds = array<i64: 64, 8>}, {pipeline_mode = #tpu.pipeline_mode<synchronous>, transform_indices = @transform_1, window_bounds = array<i64: 1, 8>}, {pipeline_mode = #tpu.pipeline_mode<synchronous>, transform_indices = @transform_2, window_bounds = array<i64: 1, 8>}, {transform_indices = @transform_3, window_bounds = array<i64: 64, 4>}, {pipeline_mode = #tpu.pipeline_mode<synchronous>, transform_indices = @transform_4, window_bounds = array<i64: 4, 8>}, {pipeline_mode = #tpu.pipeline_mode<synchronous>, transform_indices = @transform_5, window_bounds = array<i64: 1, 8>}, {transform_indices = @transform_6, window_bounds = array<i64: 64, 8>}]} {
    %c0 = arith.constant 0 : index
    %c0_0 = arith.constant 0 : index
    %0 = vector.load %arg1[%c0, %c0_0] : memref<64x8xf32, #tpu.memory_space<vmem>>, vector<64x8xf32>
    %c0_1 = arith.constant 0 : index
    %c0_2 = arith.constant 0 : index
    %1 = vector.load %arg4[%c0_1, %c0_2] : memref<64x4xf32, #tpu.memory_space<vmem>>, vector<64x4xf32>
    %c0_3 = arith.constant 0 : index
    %c0_4 = arith.constant 0 : index
    %2 = vector.load %arg5[%c0_3, %c0_4] : memref<4x8xf32, #tpu.memory_space<vmem>>, vector<4x8xf32>
    %cst = arith.constant dense<0.000000e+00> : vector<64x8xf32>
    %3 = tpu.matmul %1, %2, %cst {dimension_numbers = #tpu.dot_dimension_numbers<[1], [0], [0], [1], [0, 0, 1, 1], [], []>} : vector<64x4xf32>, vector<4x8xf32>, vector<64x8xf32> -> vector<64x8xf32>
    %c0_5 = arith.constant 0 : index
    %c0_6 = arith.constant 0 : index
    %4 = vector.load %arg2[%c0_5, %c0_6] : memref<1x8xf32, #tpu.memory_space<vmem>>, vector<1x8xf32>
    %5 = vector.broadcast %4 : vector<1x8xf32> to vector<64x8xf32>
    %6 = arith.mulf %0, %5 : vector<64x8xf32>
    %c0_7 = arith.constant 0 : index
    %c0_8 = arith.constant 0 : index
    %7 = vector.load %arg3[%c0_7, %c0_8] : memref<1x8xf32, #tpu.memory_space<vmem>>, vector<1x8xf32>
    %8 = vector.broadcast %7 : vector<1x8xf32> to vector<64x8xf32>
    %9 = arith.addf %6, %8 : vector<64x8xf32>
    %10 = arith.addf %9, %3 : vector<64x8xf32>
    %c0_9 = arith.constant 0 : index
    %c0_10 = arith.constant 0 : index
    %11 = vector.load %arg6[%c0_9, %c0_10] : memref<1x8xf32, #tpu.memory_space<vmem>>, vector<1x8xf32>
    %12 = vector.broadcast %11 : vector<1x8xf32> to vector<64x8xf32>
    %13 = arith.addf %10, %12 : vector<64x8xf32>
    %cst_11 = arith.constant 0.000000e+00 : f32
    %14 = vector.broadcast %cst_11 : f32 to vector<64x8xf32>
    %15 = arith.maximumf %13, %14 : vector<64x8xf32>
    %c0_12 = arith.constant 0 : index
    %c0_13 = arith.constant 0 : index
    %16 = vector.load %arg7[%c0_12, %c0_13] : memref<64x8xf32, #tpu.memory_space<vmem>>, vector<64x8xf32>
    tpu.vector_store %arg7[%c0_12, %c0_13], %15 {strides = array<i32>} : memref<64x8xf32, #tpu.memory_space<vmem>>, vector<64x8xf32>,
    return
  }
  func.func @transform_0(%arg0: i32) -> (i32, i32) {
    %c0_i32 = arith.constant 0 : i32
    %c0_i32_0 = arith.constant 0 : i32
    return %arg0, %c0_i32 : i32, i32
  }
  func.func @transform_1(%arg0: i32) -> (i32, i32) {
    %c0_i32 = arith.constant 0 : i32
    %c0_i32_0 = arith.constant 0 : i32
    %c0_i32_1 = arith.constant 0 : i32
    return %c0_i32, %c0_i32_0 : i32, i32
  }
  func.func @transform_2(%arg0: i32) -> (i32, i32) {
    %c0_i32 = arith.constant 0 : i32
    %c0_i32_0 = arith.constant 0 : i32
    %c0_i32_1 = arith.constant 0 : i32
    return %c0_i32, %c0_i32_0 : i32, i32
  }
  func.func @transform_3(%arg0: i32) -> (i32, i32) {
    %c0_i32 = arith.constant 0 : i32
    %c0_i32_0 = arith.constant 0 : i32
    return %arg0, %c0_i32 : i32, i32
  }
  func.func @transform_4(%arg0: i32) -> (i32, i32) {
    %c0_i32 = arith.constant 0 : i32
    %c0_i32_0 = arith.constant 0 : i32
    %c0_i32_1 = arith.constant 0 : i32
    return %c0_i32, %c0_i32_0 : i32, i32
  }
  func.func @transform_5(%arg0: i32) -> (i32, i32) {
    %c0_i32 = arith.constant 0 : i32
    %c0_i32_0 = arith.constant 0 : i32
    %c0_i32_1 = arith.constant 0 : i32
    return %c0_i32, %c0_i32_0 : i32, i32
  }
  func.func @transform_6(%arg0: i32) -> (i32, i32) {
    %c0_i32 = arith.constant 0 : i32
    %c0_i32_0 = arith.constant 0 : i32
    return %arg0, %c0_i32 : i32, i32
  }
}

</mosaic_0001>

<bundles_post_ra>
// kernel: residual_block_B_forward.3
= control target key start
LH: loop header
LB: loop body
LE: loop exit
PB: predicated region body
PF: predicated region fallthrough
CT: control target
= control target key end

     0   :  { %s643_s15 = smov 0   ;;  %s725_s0 = inlined_call_operand.vmem [shape: f32[128,36], index: 0, kind: input, shape index: {}]   ;;  %s726_s1 = inlined_call_operand.vmem [shape: f32[36,8], index: 1, kind: input, shape index: {}]   ;;  %s727_s2 = inlined_call_operand.vmem [shape: f32[128,8], index: 2, kind: output, shape index: {0}]   ;;  %s728_s3 = inlined_call_operand.vmem [shape: f32[2,1,8], index: 3, kind: output, shape index: {1}]   ;;  %s729_s4 = inlined_call_operand.vmem [shape: f32[2,1,8], index: 4, kind: output, shape index: {2}]  }
   0x1 LB: > { %s649_s16 = sadd.s32 4294967295, %s616_s15   ;;  %p537_p0 = scmp.ge.s32.totalorder %s616_s15, 1  ;;  %s616_s15 = sphi %s643_s15, %s15_s15  }
   0x2   : > { %p168_p1 = scmp.lt.s32.totalorder %s616_s15, 3 }
   0x4   : > { %p169_p2 = pnand %p537_p0, %p168_p1 }
   0x5   : > { %v226_v0 = vld [vmem:[%s726_s1] sm:$0xff] (!%p169_p2)  ;;  %v227_v1 = vld [vmem:[%s726_s1 + $0x8] sm:$0xff] (!%p169_p2)  ;;  %v228_v2 = vld [vmem:[%s726_s1 + $0x10] sm:$0xff] (!%p169_p2)  ;;  %s538_s23 = sshll.u32 (!%p169_p2), %s649_s16, 3  ;;  %vm231_vm0 = vcmask (!%p169_p2), 293888   ;;  %vm256_vm1 = vcmask (!%p169_p2), 1043456  }
   0x6   : > { %172 = sbr.rel (%p169_p2) target bundleno = 263 (0x107), region = 28  ;;  %v588_v3 = vpack.c.bf16 (!%p169_p2), %v227_v1, %v226_v0  ;;  %v229_v4 = vld [vmem:[%s726_s1 + $0x18] sm:$0xff] (!%p169_p2)  ;;  %p201_p3 = scmp.lt.s32.totalorder (!%p169_p2), %s538_s23, 15  ;;  %v230_v6 = vld [vmem:[%s726_s1 + $0x20] sm:$0xf] (!%p169_p2)  ;;  %vm365_vm2 = vcmask (!%p169_p2), 64512  }
   0x7   : > { %v592_v5 = vpack.c.bf16 (!%p169_p2), %v229_v4, %v228_v2  ;;  %p212_p4 = scmp.lt.s32.totalorder (!%p169_p2), %s649_s16, 1  ;;  %vm395_vm3 = vcmask (!%p169_p2), 57344  }
   0x8   : > { %589 = vmatprep.subr.bf16.mxu0 (!%p169_p2), %v588_v3  ;;  %596 = vmatprep.subr.bf16.mxu1 (!%p169_p2), %v588_v3 }
   0x9   : > { %591 = vmatpush3.bf16.msra.mxu0 (!%p169_p2), %v588_v3  ;;  %599 = vmatpush3.bf16.msra.mxu1 (!%p169_p2), %v588_v3 }
   0xa   : > { %593 = vmatprep.subr.bf16.mxu0 (!%p169_p2), %v592_v5  ;;  %597 = vmatprep.subr.bf16.mxu1 (!%p169_p2), %v592_v5 }
   0xd   : > { %s731_s23 = smov (!%p201_p3, %s538_s23), 15  ;;  %595 = vmatpush3.bf16.msra.mxu0 %v592_v5  ;;  %600 = vmatpush3.bf16.msra.mxu1 %v592_v5  ;;  %s733_s16 = smov (!%p212_p4, %s649_s16), 1 }
   0xe   : > { %s539_s26 = sshll.u32 %s731_s23, 3  ;;  %574 = vmatprep.subr.msk.mxu0 %vm256_vm1, %v230_v6  ;;  %598 = vmatprep.subr.msk.mxu1 %vm256_vm1, %v230_v6  ;;  %s214_s11 = scalar_lea.vmem %s728_s3, %s733_s16 }
   0xf   : > { %s204_s5 = scalar_lea.vmem %s725_s0, %s539_s26  ;;  %s210_s8 = scalar_lea.vmem %s727_s2, %s539_s26 }
  0x10   : > { %v218_v7 = vld [vmem:[%s204_s5] sm:$0xff]  ;;  %v219_v9 = vld [vmem:[%s204_s5 + $0x8] sm:$0xff]  ;;  %v220_v10 = vld [vmem:[%s204_s5 + $0x10] sm:$0xff]  ;;  %s217_s14 = scalar_lea.vmem %s729_s4, %s733_s16 }
  0x11   : > { %576 = vmatprep.mubr.msk.f32.mxu0 %vm231_vm0, %v218_v7  ;;  %v222_v8 = vld [vmem:[%s204_s5 + $0x20] sm:$0xff]  ;;  %v223_v11 = vld [vmem:[%s204_s5 + $0x28] sm:$0xff]  ;;  %575 = vmatpush3.msk.msra.mxu0 %vm256_vm1, %v230_v6  ;;  %v224_v12 = vld [vmem:[%s204_s5 + $0x30] sm:$0xff] }
  0x12   : > { %582 = vmatprep.mubr.msk.f32.mxu1 %vm231_vm0, %v222_v8  ;;  %577 = vmatmul.mubr.msk.f32.vlgmr.msra.gmra.mrb[0].mxu0 %vm231_vm0, %v219_v9  ;;  %v221_v13 = vld [vmem:[%s204_s5 + $0x18] sm:$0xff] }
  0x13   : > { %601 = vmatpush3.msk.msra.mxu1 %vm256_vm1, %v230_v6  ;;  %579 = vmatprep.mubr.msk.f32.mxu0 %vm231_vm0, %v220_v10  ;;  %v225_v14 = vld [vmem:[%s204_s5 + $0x38] sm:$0xff] }
  0x14   : > { %583 = vmatmul.mubr.msk.f32.vlgmr.msra.gmra.mrb[0].mxu1 %vm231_vm0, %v223_v11 }
  0x15   : > { %585 = vmatprep.mubr.msk.f32.mxu1 %vm231_vm0, %v224_v12 }
  0x16   : > { %580 = vmatmul.mubr.msk.f32.gmra.mrb[2].mxu0 %vm231_vm0, %v221_v13 }
  0x18   : > { %586 = vmatmul.mubr.msk.f32.gmra.mrb[2].mxu1 %vm231_vm0, %v225_v14 }
  0xe5   : > { %v578_v15 = vpop.f32.mrb[0].mxu0 }
  0xe6   : > { %367 = vst.msk [vmem:[%s210_s8 + $0x8] sm:$0xff] %vm365_vm2, %v578_v15  ;;  %v375_v16 = vsel %vm365_vm2, %v578_v15, 0.0  ;;  %v398_v17 = vmul.f32 %v578_v15, %v578_v15  ;;  %v326_v18 = vpop.f32.mrb[1].mxu0 }
  0xe7   : > { %v584_v19 = vpop.f32.mrb[0].mxu1  ;;  %366 = vst.msk [vmem:[%s210_s8] sm:$0xff] %vm365_vm2, %v326_v18  ;;  %v374_v20 = vsel %vm365_vm2, %v326_v18, 0.0  ;;  %v397_v21 = vmul.f32 %v326_v18, %v326_v18 }
  0xe8   : > { %371 = vst.msk [vmem:[%s210_s8 + $0x28] sm:$0xff] %vm365_vm2, %v584_v19  ;;  %v346_v22 = vpop.f32.mrb[1].mxu1  ;;  %v406_v23 = vsel %vm365_vm2, %v398_v17, 0.0  ;;  %v376_v24 = vadd.f32 %v375_v16, %v374_v20  ;;  %v402_v42 = vmul.f32 %v584_v19, %v584_v19  ;;  %v383_v47 = vsel %vm365_vm2, %v584_v19, 0.0 }
  0xe9   : > { %370 = vst.msk [vmem:[%s210_s8 + $0x20] sm:$0xff] %vm365_vm2, %v346_v22  ;;  %v405_v25 = vsel %vm365_vm2, %v397_v21, 0.0  ;;  %v581_v26 = vpop.f32.mrb[2].mxu0  ;;  %v401_v33 = vmul.f32 %v346_v22, %v346_v22  ;;  %v381_v38 = vsel %vm365_vm2, %v346_v22, 0.0 }
  0xea   : > { %v407_v27 = vadd.f32 %v406_v23, %v405_v25  ;;  %369 = vst.msk [vmem:[%s210_s8 + $0x18] sm:$0xff] %vm365_vm2, %v581_v26  ;;  %v336_v28 = vpop.f32.mrb[3].mxu0  ;;  %v400_v30 = vmul.f32 %v581_v26, %v581_v26  ;;  %v379_v36 = vsel %vm365_vm2, %v581_v26, 0.0  ;;  %v414_v51 = vsel %vm365_vm2, %v402_v42, 0.0 }
  0xeb   : > { %v587_v29 = vpop.f32.mrb[2].mxu1  ;;  %368 = vst.msk [vmem:[%s210_s8 + $0x10] sm:$0xff] %vm365_vm2, %v336_v28  ;;  %v377_v31 = vsel %vm365_vm2, %v336_v28, 0.0  ;;  %v399_v32 = vmul.f32 %v336_v28, %v336_v28  ;;  %v412_v43 = vsel %vm365_vm2, %v401_v33, 0.0 }
  0xec   : > { %373 = vst.msk [vmem:[%s210_s8 + $0x38] sm:$0xff] %vm365_vm2, %v587_v29  ;;  %v356_v34 = vpop.f32.mrb[3].mxu1  ;;  %v378_v35 = vadd.f32 %v377_v31, %v376_v24  ;;  %v410_v41 = vsel %vm365_vm2, %v400_v30, 0.0  ;;  %v404_v52 = vmul.f32 %v587_v29, %v587_v29  ;;  %v387_v56 = vsel %vm365_vm2, %v587_v29, 0.0 }
  0xed   : > { %372 = vst.msk [vmem:[%s210_s8 + $0x30] sm:$0xff] %vm365_vm2, %v356_v34  ;;  %v408_v37 = vsel %vm365_vm2, %v399_v32, 0.0  ;;  %v403_v44 = vmul.f32 %v356_v34, %v356_v34  ;;  %v385_v48 = vsel %vm365_vm2, %v356_v34, 0.0 }
  0xee   : > { %v380_v39 = vadd.f32 %v379_v36, %v378_v35  ;;  %v409_v40 = vadd.f32 %v408_v37, %v407_v27  ;;  %v418_v59 = vsel %vm365_vm2, %v404_v52, 0.0 }
  0xef   : > { %v416_v53 = vsel %vm365_vm2, %v403_v44, 0.0 }
  0xf0   : > { %v411_v45 = vadd.f32 %v410_v41, %v409_v40  ;;  %v382_v46 = vadd.f32 %v381_v38, %v380_v39 }
  0xf2   : > { %v413_v49 = vadd.f32 %v412_v43, %v411_v45  ;;  %v384_v50 = vadd.f32 %v383_v47, %v382_v46 }
  0xf4   : > { %v386_v54 = vadd.f32 %v385_v48, %v384_v50  ;;  %v415_v55 = vadd.f32 %v414_v51, %v413_v49 }
  0xf6   : > { %v388_v57 = vadd.f32 %v387_v56, %v386_v54  ;;  %v417_v58 = vadd.f32 %v416_v53, %v415_v55 }
  0xf8   : > { %v389_v60 = vrot.slane %v388_v57, 4  ;;  %v419_v61 = vadd.f32 %v418_v59, %v417_v58 }
  0xfa   : > { %v390_v62 = vadd.f32 %v389_v60, %v388_v57  ;;  %v420_v63 = vrot.slane %v419_v61, 4 }
  0xfc   : > { %v391_v0 = vrot.slane %v390_v62, 2  ;;  %v421_v1 = vadd.f32 %v420_v63, %v419_v61 }
  0xfe   : > { %v392_v2 = vadd.f32 %v391_v0, %v390_v62  ;;  %v422_v3 = vrot.slane %v421_v1, 2 }
 0x100   : > { %v393_v4 = vrot.slane %v392_v2, 1  ;;  %v423_v5 = vadd.f32 %v422_v3, %v421_v1 }
 0x102   : > { %v394_v6 = vadd.f32 %v393_v4, %v392_v2  ;;  %v424_v7 = vrot.slane %v423_v5, 1 }
 0x104   : > { %396 = vst.msk [vmem:[%s214_s11] sm:$0x1] %vm395_vm3, %v394_v6  ;;  %v425_v8 = vadd.f32 %v424_v7, %v423_v5 }
 0x106   : > { %426 = vst.msk [vmem:[%s217_s14] sm:$0x1] %vm395_vm3, %v425_v8 }
 0x107 PF: > { %s15_s15 = sadd.s32 1, %s616_s15  }
 0x108   : > { %p12_p5 = scmp.ge.s32.totalorder %s15_s15, 4  }
 0x10a   :  { %14 = sbr.rel (!%p12_p5) target bundleno = 1 (0x1), region = 82 }

// kernel: residual_block_B_forward.4
= control target key start
LH: loop header
LB: loop body
LE: loop exit
PB: predicated region body
PF: predicated region fallthrough
CT: control target
= control target key end

     0   :  { %s666_s15 = smov 0   ;;  %s770_s0 = inlined_call_operand.vmem [shape: f32[128,72], index: 0, kind: input, shape index: {}]   ;;  %s771_s1 = inlined_call_operand.vmem [shape: f32[72,8], index: 1, kind: input, shape index: {}]   ;;  %s772_s2 = inlined_call_operand.vmem [shape: f32[128,8], index: 2, kind: output, shape index: {0}]   ;;  %s773_s3 = inlined_call_operand.vmem [shape: f32[2,1,8], index: 3, kind: output, shape index: {1}]   ;;  %s774_s4 = inlined_call_operand.vmem [shape: f32[2,1,8], index: 4, kind: output, shape index: {2}]  }
   0x1 LB: > { %s672_s16 = sadd.s32 4294967295, %s639_s15   ;;  %p537_p0 = scmp.ge.s32.totalorder %s639_s15, 1  ;;  %s639_s15 = sphi %s666_s15, %s15_s15  }
   0x2   : > { %p168_p1 = scmp.lt.s32.totalorder %s639_s15, 3 }
   0x4   : > { %p169_p2 = pnand %p537_p0, %p168_p1 }
   0x5   : > { %v226_v0 = vld [vmem:[%s771_s1] sm:$0xff] (!%p169_p2)  ;;  %v227_v1 = vld [vmem:[%s771_s1 + $0x8] sm:$0xff] (!%p169_p2)  ;;  %v228_v2 = vld [vmem:[%s771_s1 + $0x10] sm:$0xff] (!%p169_p2)  ;;  %s538_s23 = sshll.u32 (!%p169_p2), %s672_s16, 3  ;;  %vm235_vm0 = vcmask (!%p169_p2), 588800   ;;  %vm365_vm1 = vcmask (!%p169_p2), 64512  }
   0x6   : > { %172 = sbr.rel (%p169_p2) target bundleno = 271 (0x10f), region = 28  ;;  %v599_v3 = vpack.c.bf16 (!%p169_p2), %v227_v1, %v226_v0  ;;  %v229_v4 = vld [vmem:[%s771_s1 + $0x18] sm:$0xff] (!%p169_p2)  ;;  %p201_p3 = scmp.lt.s32.totalorder (!%p169_p2), %s538_s23, 15  ;;  %v230_v6 = vld [vmem:[%s771_s1 + $0x20] sm:$0xff] (!%p169_p2)  ;;  %v231_v7 = vld [vmem:[%s771_s1 + $0x28] sm:$0xff] (!%p169_p2)  ;;  %vm395_vm2 = vcmask (!%p169_p2), 57344  }
   0x7   : > { %v603_v5 = vpack.c.bf16 (!%p169_p2), %v229_v4, %v228_v2  ;;  %v607_v8 = vpack.c.bf16 (!%p169_p2), %v231_v7, %v230_v6  ;;  %v232_v9 = vld [vmem:[%s771_s1 + $0x30] sm:$0xff] (!%p169_p2)  ;;  %v233_v10 = vld [vmem:[%s771_s1 + $0x38] sm:$0xff] (!%p169_p2)  ;;  %v234_v14 = vld [vmem:[%s771_s1 + $0x40] sm:$0xff] (!%p169_p2)  ;;  %p212_p4 = scmp.lt.s32.totalorder (!%p169_p2), %s672_s16, 1 }
   0x8   : > { %600 = vmatprep.subr.bf16.mxu0 (!%p169_p2), %v599_v3  ;;  %615 = vmatprep.subr.bf16.mxu1 (!%p169_p2), %v599_v3  ;;  %v611_v13 = vpack.c.bf16 (!%p169_p2), %v233_v10, %v232_v9 }
   0x9   : > { %602 = vmatpush3.bf16.msra.mxu0 (!%p169_p2), %v599_v3  ;;  %620 = vmatpush3.bf16.msra.mxu1 (!%p169_p2), %v599_v3 }
   0xa   : > { %604 = vmatprep.subr.bf16.mxu0 (!%p169_p2), %v603_v5  ;;  %616 = vmatprep.subr.bf16.mxu1 (!%p169_p2), %v603_v5 }
   0xd   : > { %s776_s23 = smov (!%p201_p3, %s538_s23), 15  ;;  %606 = vmatpush3.bf16.msra.mxu0 %v603_v5  ;;  %621 = vmatpush3.bf16.msra.mxu1 %v603_v5  ;;  %s778_s16 = smov (!%p212_p4, %s672_s16), 1 }
   0xe   : > { %s539_s30 = sshll.u32 %s776_s23, 3  ;;  %608 = vmatprep.subr.bf16.mxu0 %v607_v8  ;;  %617 = vmatprep.subr.bf16.mxu1 %v607_v8  ;;  %s214_s21 = scalar_lea.vmem %s773_s3, %s778_s16 }
   0xf   : > { %s709_s11 = scalar_lea.vmem %s770_s0, %s539_s30  ;;  %s210_s18 = scalar_lea.vmem %s772_s2, %s539_s30 }
  0x10   : > { %v218_v11 = vld [vmem:[%s709_s11] sm:$0xff]  ;;  %v219_v15 = vld [vmem:[%s709_s11 + $0x8] sm:$0xff]  ;;  %v220_v17 = vld [vmem:[%s709_s11 + $0x10] sm:$0xff]  ;;  %s217_s24 = scalar_lea.vmem %s774_s4, %s778_s16 }
  0x11   : > { %v222_v12 = vld [vmem:[%s709_s11 + $0x20] sm:$0xff]  ;;  %587 = vmatprep.mubr.msk.f32.mxu0 %vm235_vm0, %v218_v11  ;;  %610 = vmatpush3.bf16.msra.mxu0 %v607_v8  ;;  %v223_v16 = vld [vmem:[%s709_s11 + $0x28] sm:$0xff]  ;;  %v224_v18 = vld [vmem:[%s709_s11 + $0x30] sm:$0xff] }
  0x12   : > { %593 = vmatprep.mubr.msk.f32.mxu1 %vm235_vm0, %v222_v12  ;;  %622 = vmatpush3.bf16.msra.mxu1 %v607_v8  ;;  %v221_v19 = vld [vmem:[%s709_s11 + $0x18] sm:$0xff] }
  0x13   : > { %612 = vmatprep.subr.bf16.mxu0 %v611_v13  ;;  %618 = vmatprep.subr.bf16.mxu1 %v611_v13  ;;  %v225_v20 = vld [vmem:[%s709_s11 + $0x38] sm:$0xff] }
  0x15   : > { %614 = vmatpush3.bf16.msra.mxu0 %v611_v13 }
  0x16   : > { %623 = vmatpush3.bf16.msra.mxu1 %v611_v13  ;;  %585 = vmatprep.subr.mxu0 %v234_v14 }
  0x17   : > { %619 = vmatprep.subr.mxu1 %v234_v14 }
  0x19   : > { %586 = vmatpush3.msra.mxu0 %v234_v14 }
  0x1a   : > { %624 = vmatpush3.msra.mxu1 %v234_v14  ;;  %588 = vmatmul.mubr.msk.f32.vlgmr.msra.gmra.mrb[0].mxu0 %vm235_vm0, %v219_v15 }
  0x1b   : > { %594 = vmatmul.mubr.msk.f32.vlgmr.msra.gmra.mrb[0].mxu1 %vm235_vm0, %v223_v16  ;;  %590 = vmatprep.mubr.msk.f32.mxu0 %vm235_vm0, %v220_v17 }
  0x1c   : > { %596 = vmatprep.mubr.msk.f32.mxu1 %vm235_vm0, %v224_v18 }
  0x1e   : > { %591 = vmatmul.mubr.msk.f32.gmra.mrb[2].mxu0 %vm235_vm0, %v221_v19 }
  0x1f   : > { %597 = vmatmul.mubr.msk.f32.gmra.mrb[2].mxu1 %vm235_vm0, %v225_v20 }
  0xed   : > { %v589_v21 = vpop.f32.mrb[0].mxu0 }
  0xee   : > { %v595_v22 = vpop.f32.mrb[0].mxu1  ;;  %367 = vst.msk [vmem:[%s210_s18 + $0x8] sm:$0xff] %vm365_vm1, %v589_v21  ;;  %v375_v23 = vsel %vm365_vm1, %v589_v21, 0.0  ;;  %v398_v24 = vmul.f32 %v589_v21, %v589_v21  ;;  %v326_v25 = vpop.f32.mrb[1].mxu0 }
  0xef   : > { %371 = vst.msk [vmem:[%s210_s18 + $0x28] sm:$0xff] %vm365_vm1, %v595_v22  ;;  %v346_v26 = vpop.f32.mrb[1].mxu1  ;;  %366 = vst.msk [vmem:[%s210_s18] sm:$0xff] %vm365_vm1, %v326_v25  ;;  %v374_v27 = vsel %vm365_vm1, %v326_v25, 0.0  ;;  %v397_v28 = vmul.f32 %v326_v25, %v326_v25  ;;  %v402_v48 = vmul.f32 %v595_v22, %v595_v22  ;;  %v383_v53 = vsel %vm365_vm1, %v595_v22, 0.0 }
  0xf0   : > { %370 = vst.msk [vmem:[%s210_s18 + $0x20] sm:$0xff] %vm365_vm1, %v346_v26  ;;  %v406_v29 = vsel %vm365_vm1, %v398_v24, 0.0  ;;  %v376_v30 = vadd.f32 %v375_v23, %v374_v27  ;;  %v401_v40 = vmul.f32 %v346_v26, %v346_v26  ;;  %v381_v44 = vsel %vm365_vm1, %v346_v26, 0.0 }
  0xf1   : > { %v405_v31 = vsel %vm365_vm1, %v397_v28, 0.0  ;;  %v592_v32 = vpop.f32.mrb[2].mxu0  ;;  %v414_v57 = vsel %vm365_vm1, %v402_v48, 0.0 }
  0xf2   : > { %v598_v33 = vpop.f32.mrb[2].mxu1  ;;  %v407_v34 = vadd.f32 %v406_v29, %v405_v31  ;;  %369 = vst.msk [vmem:[%s210_s18 + $0x18] sm:$0xff] %vm365_vm1, %v592_v32  ;;  %v336_v35 = vpop.f32.mrb[3].mxu0  ;;  %v400_v37 = vmul.f32 %v592_v32, %v592_v32  ;;  %v379_v42 = vsel %vm365_vm1, %v592_v32, 0.0  ;;  %v412_v49 = vsel %vm365_vm1, %v401_v40, 0.0 }
  0xf3   : > { %373 = vst.msk [vmem:[%s210_s18 + $0x38] sm:$0xff] %vm365_vm1, %v598_v33  ;;  %v356_v36 = vpop.f32.mrb[3].mxu1  ;;  %368 = vst.msk [vmem:[%s210_s18 + $0x10] sm:$0xff] %vm365_vm1, %v336_v35  ;;  %v377_v38 = vsel %vm365_vm1, %v336_v35, 0.0  ;;  %v399_v39 = vmul.f32 %v336_v35, %v336_v35  ;;  %v404_v58 = vmul.f32 %v598_v33, %v598_v33  ;;  %v387_v62 = vsel %vm365_vm1, %v598_v33, 0.0 }
  0xf4   : > { %372 = vst.msk [vmem:[%s210_s18 + $0x30] sm:$0xff] %vm365_vm1, %v356_v36  ;;  %v378_v41 = vadd.f32 %v377_v38, %v376_v30  ;;  %v410_v47 = vsel %vm365_vm1, %v400_v37, 0.0  ;;  %v403_v50 = vmul.f32 %v356_v36, %v356_v36  ;;  %v385_v54 = vsel %vm365_vm1, %v356_v36, 0.0 }
  0xf5   : > { %v408_v43 = vsel %vm365_vm1, %v399_v39, 0.0  ;;  %v418_v1 = vsel %vm365_vm1, %v404_v58, 0.0 }
  0xf6   : > { %v380_v45 = vadd.f32 %v379_v42, %v378_v41  ;;  %v409_v46 = vadd.f32 %v408_v43, %v407_v34  ;;  %v416_v59 = vsel %vm365_vm1, %v403_v50, 0.0 }
  0xf8   : > { %v411_v51 = vadd.f32 %v410_v47, %v409_v46  ;;  %v382_v52 = vadd.f32 %v381_v44, %v380_v45 }
  0xfa   : > { %v413_v55 = vadd.f32 %v412_v49, %v411_v51  ;;  %v384_v56 = vadd.f32 %v383_v53, %v382_v52 }
  0xfc   : > { %v386_v60 = vadd.f32 %v385_v54, %v384_v56  ;;  %v415_v61 = vadd.f32 %v414_v57, %v413_v55 }
  0xfe   : > { %v388_v63 = vadd.f32 %v387_v62, %v386_v60  ;;  %v417_v0 = vadd.f32 %v416_v59, %v415_v61 }
 0x100   : > { %v389_v2 = vrot.slane %v388_v63, 4  ;;  %v419_v3 = vadd.f32 %v418_v1, %v417_v0 }
 0x102   : > { %v390_v4 = vadd.f32 %v389_v2, %v388_v63  ;;  %v420_v5 = vrot.slane %v419_v3, 4 }
 0x104   : > { %v391_v6 = vrot.slane %v390_v4, 2  ;;  %v421_v7 = vadd.f32 %v420_v5, %v419_v3 }
 0x106   : > { %v392_v8 = vadd.f32 %v391_v6, %v390_v4  ;;  %v422_v9 = vrot.slane %v421_v7, 2 }
 0x108   : > { %v393_v10 = vrot.slane %v392_v8, 1  ;;  %v423_v11 = vadd.f32 %v422_v9, %v421_v7 }
 0x10a   : > { %v394_v12 = vadd.f32 %v393_v10, %v392_v8  ;;  %v424_v13 = vrot.slane %v423_v11, 1 }
 0x10c   : > { %396 = vst.msk [vmem:[%s214_s21] sm:$0x1] %vm395_vm2, %v394_v12  ;;  %v425_v14 = vadd.f32 %v424_v13, %v423_v11 }
 0x10e   : > { %426 = vst.msk [vmem:[%s217_s24] sm:$0x1] %vm395_vm2, %v425_v14 }
 0x10f PF: > { %s15_s15 = sadd.s32 1, %s639_s15  }
 0x110   : > { %p12_p5 = scmp.ge.s32.totalorder %s15_s15, 4  }
 0x112   :  { %14 = sbr.rel (!%p12_p5) target bundleno = 1 (0x1), region = 82 }

// kernel: residual_block_B_forward.5
= control target key start
LH: loop header
LB: loop body
LE: loop exit
PB: predicated region body
PF: predicated region fallthrough
CT: control target
= control target key end

     0   :  { %s667_s21 = smov 0   ;;  %s730_s0 = inlined_call_operand.vmem [shape: f32[128,8], index: 0, kind: input, shape index: {}, may-alias: {0,6}]   ;;  %s731_s1 = inlined_call_operand.vmem [shape: f32[1,8], index: 1, kind: input, shape index: {}]   ;;  %s732_s2 = inlined_call_operand.vmem [shape: f32[1,8], index: 2, kind: input, shape index: {}]   ;;  %s733_s3 = inlined_call_operand.vmem [shape: f32[128,4], index: 3, kind: input, shape index: {}]   ;;  %s734_s4 = inlined_call_operand.vmem [shape: f32[4,8], index: 4, kind: input, shape index: {}]   ;;  %s735_s5 = inlined_call_operand.vmem [shape: f32[1,8], index: 5, kind: input, shape index: {}]   ;;  %s736_s6 = inlined_call_operand.vmem [shape: f32[128,8], index: 6, kind: output, shape index: {}, may-alias: {0,6}]  }
   0x1 LB: > { %s566_s22 = sadd.s32 4294967295, %s630_s21   ;;  %p570_p0 = scmp.ge.s32.totalorder %s630_s21, 1  ;;  %s630_s21 = sphi %s667_s21, %s16_s21  }
   0x2   : > { %p224_p1 = scmp.lt.s32.totalorder %s630_s21, 3 }
   0x4   : > { %p225_p2 = pnand %p570_p0, %p224_p1 }
   0x5   : > { %v293_v0 = vld [vmem:[%s734_s4] sm:$0xf] (!%p225_p2)  ;;  %vm319_vm0 = vcmask (!%p225_p2), 1043456   ;;  %s571_s25 = sshll.u32 (!%p225_p2), %s566_s22, 3  ;;  %vm294_vm1 = vcmask (!%p225_p2), 31744   ;;  %vm489_vm2 = vcmask (!%p225_p2), 64512  }
   0x6   : > { %228 = sbr.rel (%p225_p2) target bundleno = 243 (0xf3), region = 44  ;;  %600 = vmatprep.subr.msk.mxu0 (!%p225_p2), %vm319_vm0, %v293_v0  ;;  %614 = vmatprep.subr.msk.mxu1 (!%p225_p2), %vm319_vm0, %v293_v0  ;;  %p260_p3 = scmp.lt.s32.totalorder (!%p225_p2), %s571_s25, 15  ;;  %v586_v10 = vld [vmem:[%s731_s1] ss:$0 sm:$0xff] (!%p225_p2) }
   0x7   : > { %601 = vmatpush3.msk.msra.mxu0 (!%p225_p2), %vm319_vm0, %v293_v0  ;;  %615 = vmatpush3.msk.msra.mxu1 (!%p225_p2), %vm319_vm0, %v293_v0  ;;  %v587_v16 = vld [vmem:[%s732_s2] ss:$0 sm:$0xff] (!%p225_p2) }
   0x8   : > { %v588_v32 = vld [vmem:[%s735_s5] ss:$0 sm:$0xff] (!%p225_p2) }
   0xd   : > { %s738_s25 = smov (!%p260_p3, %s571_s25), 15 }
   0xe   : > { %s678_s26 = sshll.u32 %s738_s25, 3 }
   0xf   : > { %s269_s29 = scalar_lea.vmem %s733_s3, %s678_s26  ;;  %s263_s8 = scalar_lea.vmem %s730_s0, %s678_s26 }
  0x10   : > { %v285_v1 = vld [vmem:[%s269_s29] sm:$0xff]  ;;  %v286_v3 = vld [vmem:[%s269_s29 + $0x8] sm:$0xff]  ;;  %v287_v5 = vld [vmem:[%s269_s29 + $0x10] sm:$0xff]  ;;  %s709_s17 = scalar_lea.vmem %s736_s6, %s678_s26 }
  0x11   : > { %v289_v2 = vld [vmem:[%s269_s29 + $0x20] sm:$0xff]  ;;  %602 = vmatprep.mubr.msk.f32.mxu0 %vm294_vm1, %v285_v1  ;;  %v290_v4 = vld [vmem:[%s269_s29 + $0x28] sm:$0xff]  ;;  %v291_v6 = vld [vmem:[%s269_s29 + $0x30] sm:$0xff] }
  0x12   : > { %608 = vmatprep.mubr.msk.f32.mxu1 %vm294_vm1, %v289_v2  ;;  %603 = vmatmul.mubr.msk.f32.vlgmr.msra.gmra.mrb[0].mxu0 %vm294_vm1, %v286_v3  ;;  %v288_v7 = vld [vmem:[%s269_s29 + $0x18] sm:$0xff]  ;;  %v278_v9 = vld [vmem:[%s263_s8 + $0x8] sm:$0xff]  ;;  %v277_v12 = vld [vmem:[%s263_s8] sm:$0xff] }
  0x13   : > { %609 = vmatmul.mubr.msk.f32.vlgmr.msra.gmra.mrb[0].mxu1 %vm294_vm1, %v290_v4  ;;  %605 = vmatprep.mubr.msk.f32.mxu0 %vm294_vm1, %v287_v5  ;;  %v292_v8 = vld [vmem:[%s269_s29 + $0x38] sm:$0xff]  ;;  %v282_v11 = vld [vmem:[%s263_s8 + $0x28] sm:$0xff]  ;;  %v281_v13 = vld [vmem:[%s263_s8 + $0x20] sm:$0xff]  ;;  %v436_v14 = vmul.f32 %v586_v10, %v278_v9  ;;  %v435_v17 = vmul.f32 %v586_v10, %v277_v12 }
  0x14   : > { %611 = vmatprep.mubr.msk.f32.mxu1 %vm294_vm1, %v291_v6  ;;  %v440_v15 = vmul.f32 %v586_v10, %v282_v11  ;;  %v439_v18 = vmul.f32 %v586_v10, %v281_v13  ;;  %v280_v19 = vld [vmem:[%s263_s8 + $0x18] sm:$0xff]  ;;  %v279_v21 = vld [vmem:[%s263_s8 + $0x10] sm:$0xff] }
  0x15   : > { %v284_v20 = vld [vmem:[%s263_s8 + $0x38] sm:$0xff]  ;;  %v283_v22 = vld [vmem:[%s263_s8 + $0x30] sm:$0xff]  ;;  %v451_v23 = vadd.f32 %v587_v16, %v436_v14  ;;  %v438_v25 = vmul.f32 %v586_v10, %v280_v19  ;;  %v450_v27 = vadd.f32 %v587_v16, %v435_v17  ;;  %v437_v29 = vmul.f32 %v586_v10, %v279_v21 }
  0x16   : > { %606 = vmatmul.mubr.msk.f32.gmra.mrb[2].mxu0 %vm294_vm1, %v288_v7  ;;  %v455_v24 = vadd.f32 %v587_v16, %v440_v15  ;;  %v442_v26 = vmul.f32 %v586_v10, %v284_v20  ;;  %v454_v28 = vadd.f32 %v587_v16, %v439_v18  ;;  %v441_v30 = vmul.f32 %v586_v10, %v283_v22 }
  0x17   : > { %612 = vmatmul.mubr.msk.f32.gmra.mrb[2].mxu1 %vm294_vm1, %v292_v8  ;;  %v453_v38 = vadd.f32 %v587_v16, %v438_v25  ;;  %v452_v42 = vadd.f32 %v587_v16, %v437_v29 }
  0x18   : > { %v457_v39 = vadd.f32 %v587_v16, %v442_v26  ;;  %v456_v43 = vadd.f32 %v587_v16, %v441_v30 }
  0xe5   : > { %v604_v31 = vpop.f32.mrb[0].mxu0 }
  0xe6   : > { %v610_v33 = vpop.f32.mrb[0].mxu1  ;;  %v459_v34 = vadd.f32 %v604_v31, %v451_v23  ;;  %v389_v36 = vpop.f32.mrb[1].mxu0 }
  0xe7   : > { %v463_v35 = vadd.f32 %v610_v33, %v455_v24  ;;  %v409_v37 = vpop.f32.mrb[1].mxu1  ;;  %v458_v40 = vadd.f32 %v450_v27, %v389_v36 }
  0xe8   : > { %v462_v41 = vadd.f32 %v454_v28, %v409_v37  ;;  %v474_v44 = vadd.f32 %v588_v32, %v459_v34 }
  0xe9   : > { %v478_v45 = vadd.f32 %v588_v32, %v463_v35  ;;  %v473_v46 = vadd.f32 %v588_v32, %v458_v40  ;;  %v607_v48 = vpop.f32.mrb[2].mxu0 }
  0xea   : > { %v477_v47 = vadd.f32 %v588_v32, %v462_v41  ;;  %v613_v49 = vpop.f32.mrb[2].mxu1  ;;  %v482_v50 = vmax.f32 %v474_v44, 0.0  ;;  %v461_v52 = vadd.f32 %v607_v48, %v453_v38  ;;  %v399_v54 = vpop.f32.mrb[3].mxu0 }
  0xeb   : > { %v486_v51 = vmax.f32 %v478_v45, 0.0  ;;  %v465_v53 = vadd.f32 %v613_v49, %v457_v39  ;;  %v419_v55 = vpop.f32.mrb[3].mxu1  ;;  %v481_v56 = vmax.f32 %v473_v46, 0.0  ;;  %v460_v58 = vadd.f32 %v452_v42, %v399_v54 }
  0xec   : > { %v485_v57 = vmax.f32 %v477_v47, 0.0  ;;  %v464_v59 = vadd.f32 %v456_v43, %v419_v55  ;;  %v476_v60 = vadd.f32 %v588_v32, %v461_v52  ;;  %491 = vst.msk [vmem:[%s709_s17 + $0x8] sm:$0xff] %vm489_vm2, %v482_v50 }
  0xed   : > { %v480_v61 = vadd.f32 %v588_v32, %v465_v53  ;;  %495 = vst.msk [vmem:[%s709_s17 + $0x28] sm:$0xff] %vm489_vm2, %v486_v51  ;;  %v475_v62 = vadd.f32 %v588_v32, %v460_v58  ;;  %490 = vst.msk [vmem:[%s709_s17] sm:$0xff] %vm489_vm2, %v481_v56 }
  0xee   : > { %v479_v63 = vadd.f32 %v588_v32, %v464_v59  ;;  %494 = vst.msk [vmem:[%s709_s17 + $0x20] sm:$0xff] %vm489_vm2, %v485_v57  ;;  %v484_v0 = vmax.f32 %v476_v60, 0.0 }
  0xef   : > { %v488_v1 = vmax.f32 %v480_v61, 0.0  ;;  %v483_v2 = vmax.f32 %v475_v62, 0.0 }
  0xf0   : > { %v487_v3 = vmax.f32 %v479_v63, 0.0  ;;  %493 = vst.msk [vmem:[%s709_s17 + $0x18] sm:$0xff] %vm489_vm2, %v484_v0 }
  0xf1   : > { %497 = vst.msk [vmem:[%s709_s17 + $0x38] sm:$0xff] %vm489_vm2, %v488_v1  ;;  %492 = vst.msk [vmem:[%s709_s17 + $0x10] sm:$0xff] %vm489_vm2, %v483_v2 }
  0xf2   : > { %496 = vst.msk [vmem:[%s709_s17 + $0x30] sm:$0xff] %vm489_vm2, %v487_v3 }
  0xf3 PF: > { %s16_s21 = sadd.s32 1, %s630_s21  }
  0xf4   : > { %p13_p4 = scmp.ge.s32.totalorder %s16_s21, 4  }
  0xf6   :  { %15 = sbr.rel (!%p13_p4) target bundleno = 1 (0x1), region = 77 }

</bundles_post_ra>
